<compile_context>
chip_gen: v6e
topology: v6e:2x2x1
jax: 0.10.0
libtpu: 0.0.40
codegen_flags: <defaults>
</compile_context>

<pallas_src>
import jax
import jax.numpy as jnp
import numpy as np
from jax.experimental import pallas as pl
from jax.experimental.pallas import tpu as pltpu


def _round_up(x: int, m: int) -> int:
    return ((x + m - 1) // m) * m


def make_ffnn_kernel(n_hidden: int, activation: str, use_softmax: bool, K: int):
    """Fused kernel: [matmul + bias + act]*n_hidden -> matmul + bias [-> softmax] -> packed einsum."""

    def kernel(*refs):
        # refs = (x, [w_i, b_i] * n_hidden, w_out, b_out, v_packed, sel, out)
        x_ref = refs[0]
        v_ref = refs[-3]      # (TB, K*O) bf16, lane-dense packed v
        s_ref = refs[-2]      # (K*O, K)  bf16 selection matrix, VMEM-resident
        out_ref = refs[-1]    # (TB, K)   f32

        h = x_ref[...]                       # (TB, D) bf16
        idx = 1
        for _ in range(n_hidden):
            w_ref, b_ref = refs[idx], refs[idx + 1]
            idx += 2
            # Linear (eval-BN already folded into w/b): bf16 x bf16 -> f32 on the MXU.
            z = jnp.dot(h, w_ref[...], preferred_element_type=jnp.float32) + b_ref[...]
            if activation == "relu":
                z = jnp.maximum(z, 0.0)
            else:  # 'selu' (f32 elementwise; v5e has no bf16 VPU/EUP)
                alpha = 1.6732632423543772
                scale = 1.0507009873554805
                z = scale * jnp.where(z > 0.0, z, alpha * (jnp.exp(z) - 1.0))
            h = z.astype(jnp.bfloat16)       # keep the MXU fed with bf16
            # Dropout: identity at inference.

        w_ref, b_ref = refs[idx], refs[idx + 1]
        theta = jnp.dot(h, w_ref[...], preferred_element_type=jnp.float32) + b_ref[...]

        if use_softmax:
            theta = theta - jnp.max(theta, axis=1, keepdims=True)
            e = jnp.exp(theta)
            theta = e * pl.reciprocal(jnp.sum(e, axis=1, keepdims=True), approx=True)

        # forecast[b, k] = sum_o theta[b, o] * v[b, k, o], computed in the packed layout:
        #   v_packed[b, k*O + o] = v[b, k, o]   (row-major reshape in the wrapper)
        #   theta_rep[b, k*O + o] = theta[b, o] (lane replication)
        #   out = (theta_rep * v_packed) @ S    with S[k*O + o, k] = 1  (MXU reduce over O)
        theta_rep = jnp.tile(theta, (1, K))                      # (TB, K*O) f32
        prod = theta_rep * v_ref[...].astype(jnp.float32)        # full-density f32 VPU
        out_ref[...] = jnp.dot(prod.astype(jnp.bfloat16), s_ref[...],
                               preferred_element_type=jnp.float32)

    return kernel


def _choose_batch_tile(B: int, block_batch: int) -> int:
    """Batch tile: multiple of 8 sublanes, and >= 2 grid steps whenever possible so the
    ("parallel",) grid axis shards across both v7x TensorCores."""
    B8 = _round_up(max(B, 1), 8)
    tb = min(_round_up(block_batch, 8), B8)
    if tb >= B8 and B8 >= 16:
        tb = _round_up(B8 // 2, 8)
    return tb


def ffnn_forward(x, v, fused_hidden, out_w, out_b, *, activation="relu",
                 use_softmax=False, block_batch=4096):
    """fused_hidden: list of (w (in,out), b (1,out)) with eval-BatchNorm already folded in."""
    B, D = x.shape
    Bv, K, O = v.shape
    assert Bv == B
    n_hidden = len(fused_hidden)

    TB = _choose_batch_tile(B, block_batch)
    Bp = _round_up(B, TB)

    # Lane-dense packing of the dominant-bytes array: (B, K, O) -> (B, K*O) is a free,
    # contiguous reshape; the kernel consumes it in this layout (no in-kernel reshape).
    v2d = v.reshape(B, K * O).astype(jnp.bfloat16)
    x = x.astype(jnp.bfloat16)
    if Bp != B:
        x = jnp.pad(x, ((0, Bp - B), (0, 0)))
        v2d = jnp.pad(v2d, ((0, Bp - B), (0, 0)))

    # Constant 0/1 selection matrix for the O-reduction on the MXU: S[k*O + o, k] = 1.
    sel = (jnp.arange(K * O)[:, None] // O == jnp.arange(K)[None, :]).astype(jnp.bfloat16)

    inputs = [x]
    in_specs = [pl.BlockSpec((TB, D), lambda i: (i, 0))]
    for w, b in fused_hidden:
        inputs += [w.astype(jnp.bfloat16), b.astype(jnp.float32)]
        in_specs += [pl.BlockSpec(w.shape, lambda i: (0, 0)),   # resident across grid steps
                     pl.BlockSpec(b.shape, lambda i: (0, 0))]
    inputs += [out_w.astype(jnp.bfloat16), out_b.astype(jnp.float32), v2d, sel]
    in_specs += [pl.BlockSpec(out_w.shape, lambda i: (0, 0)),
                 pl.BlockSpec(out_b.shape, lambda i: (0, 0)),
                 pl.BlockSpec((TB, K * O), lambda i: (i, 0)),   # packed, lane-dense v stream
                 pl.BlockSpec(sel.shape, lambda i: (0, 0))]     # resident selection matrix

    kernel = make_ffnn_kernel(n_hidden, activation, use_softmax, K)

    # Advisory cost estimate: memory-bound, dominated by the packed v stream.
    dims = [D] + [w.shape[1] for w, _ in fused_hidden] + [out_w.shape[1]]
    flops = sum(2 * Bp * a * b for a, b in zip(dims[:-1], dims[1:])) + 4 * Bp * K * O
    transcendentals = 0
    if activation == "selu":
        transcendentals += Bp * sum(dims[1:-1])
    if use_softmax:
        transcendentals += Bp * O
    bytes_accessed = (Bp * D * 2 + Bp * K * O * 2 + Bp * K * 4
                      + sum(int(w.size) * 2 + int(b.size) * 4 for w, b in fused_hidden)
                      + int(out_w.size) * 2 + int(out_b.size) * 4 + int(sel.size) * 2)

    out = pl.pallas_call(
        kernel,
        out_shape=jax.ShapeDtypeStruct((Bp, K), jnp.float32),
        grid=(Bp // TB,),
        in_specs=in_specs,
        out_specs=pl.BlockSpec((TB, K), lambda i: (i, 0)),
        compiler_params=pltpu.CompilerParams(
            dimension_semantics=("parallel",),   # megacore-shard the batch grid (2 TCs on v7x)
            vmem_limit_bytes=32 * 1024 * 1024,   # safe on v7x (64 MiB physical) with packed v
        ),
        cost_estimate=pl.CostEstimate(flops=flops, transcendentals=transcendentals,
                                      bytes_accessed=bytes_accessed),
    )(*inputs)
    return out[:B]


# ---------------------------------------------------------------------------
# Parameter construction + BatchNorm folding + pure-JAX reference
# ---------------------------------------------------------------------------

def _xavier_normal(key, fan_in, fan_out):
    std = float(np.sqrt(2.0 / (fan_in + fan_out)))
    # stored pre-transposed: (in, out); equivalent to PyTorch weight (out, in) used as x @ W^T
    return jax.random.normal(key, (fan_in, fan_out), jnp.float32) * std


def build_params(key, num_numerical_cols, layers, output_size):
    """Synthetic parameters mirroring the module's shapes, with non-trivial BN running stats."""
    hidden = []
    in_size = num_numerical_cols
    for h in layers:
        key, kw, kb, kg, kbe, km, kvv = jax.random.split(key, 7)
        w = _xavier_normal(kw, in_size, h)
        bound = 1.0 / np.sqrt(in_size)
        b = jax.random.uniform(kb, (1, h), jnp.float32, -bound, bound)
        gamma = jax.random.uniform(kg, (h,), jnp.float32, 0.5, 1.5)
        beta = 0.1 * jax.random.normal(kbe, (h,), jnp.float32)
        run_mean = 0.1 * jax.random.normal(km, (h,), jnp.float32)
        run_var = jax.random.uniform(kvv, (h,), jnp.float32, 0.5, 1.5)
        hidden.append((w, b, gamma, beta, run_mean, run_var))
        in_size = h
    key, kw, kb = jax.random.split(key, 3)
    out_w = _xavier_normal(kw, in_size, output_size)
    bound = 1.0 / np.sqrt(in_size)
    out_b = jax.random.uniform(kb, (1, output_size), jnp.float32, -bound, bound)
    return hidden, out_w, out_b


def fold_batchnorm(hidden, out_w, out_b, eps=1e-5):
    """Fold each eval-mode BatchNorm1d exactly into the *next* Linear layer.

    Linear -> act -> BN -> (Dropout=id) -> next Linear:
      (act(.) * s + t) @ W + b == act(.) @ (s[:, None] * W) + (t @ W + b)
    """
    fused, scale, shift = [], None, None
    for (w, b, gamma, beta, mean, var) in hidden:
        if scale is not None:
            b = b + (shift @ w)[None, :]
            w = scale[:, None] * w
        scale = gamma / jnp.sqrt(var + eps)
        shift = beta - mean * scale
        fused.append((w, b))
    out_b = out_b + (shift @ out_w)[None, :]
    out_w = scale[:, None] * out_w
    return fused, out_w, out_b


def reference_forward(x, v, hidden, out_w, out_b, activation, use_softmax, eps=1e-5):
    h = x
    for (w, b, gamma, beta, mean, var) in hidden:
        h = h @ w + b
        h = jnp.maximum(h, 0.0) if activation == "relu" else jax.nn.selu(h)
        h = (h - mean) / jnp.sqrt(var + eps) * gamma + beta   # BatchNorm1d (eval)
    theta = h @ out_w + out_b
    if use_softmax:
        theta = jax.nn.softmax(theta, axis=1)
    return jnp.einsum("ij,ikj->ik", theta, v)


if __name__ == "__main__":
    # Small shapes consistent with the module's forward:
    #   x: (batch, num_numerical_cols), v: (batch, horizon, output_size); horizon*output_size = 128.
    batch = 64
    num_numerical_cols = 32
    layers = [32, 32]
    output_size = 8
    horizon = 16

    key = jax.random.PRNGKey(0)
    key, kx, kv, kp = jax.random.split(key, 4)
    x = jax.random.normal(kx, (batch, num_numerical_cols), jnp.float32)
    v = jax.random.normal(kv, (batch, horizon, output_size), jnp.float32)

    hidden, out_w, out_b = build_params(kp, num_numerical_cols, layers, output_size)
    fused_hidden, fused_out_w, fused_out_b = fold_batchnorm(hidden, out_w, out_b)

    ok = True
    for activation, use_softmax in (("relu", False), ("selu", True)):
        out = ffnn_forward(x, v, fused_hidden, fused_out_w, fused_out_b,
                           activation=activation, use_softmax=use_softmax)
        out = jax.block_until_ready(out)
        ref = reference_forward(x, v, hidden, out_w, out_b, activation, use_softmax)
        assert out.shape == (batch, horizon)
        # bf16 inputs/weights/products + approx reciprocal -> loosened tolerance vs f32 reference.
        ok &= bool(np.allclose(np.asarray(out), np.asarray(ref), rtol=5e-2, atol=5e-2))

    assert ok
    print("KERNEL_OK")
</pallas_src>

<mosaic_0001>
module attributes {stable_mosaic.version = 11 : i64} {
  func.func @kernel(%arg0: i32, %arg1: memref<32x32xbf16, #tpu.memory_space<vmem>>, %arg2: memref<32x32xbf16, #tpu.memory_space<vmem>>, %arg3: memref<1x32xf32, #tpu.memory_space<vmem>>, %arg4: memref<32x32xbf16, #tpu.memory_space<vmem>>, %arg5: memref<1x32xf32, #tpu.memory_space<vmem>>, %arg6: memref<32x8xbf16, #tpu.memory_space<vmem>>, %arg7: memref<1x8xf32, #tpu.memory_space<vmem>>, %arg8: memref<32x128xbf16, #tpu.memory_space<vmem>>, %arg9: memref<128x16xbf16, #tpu.memory_space<vmem>>, %arg10: memref<32x16xf32, #tpu.memory_space<vmem>>) attributes {dimension_semantics = [#tpu.dimension_semantics<parallel>], iteration_bounds = array<i64: 2>, scalar_prefetch = 0 : i64, scratch_operands = 0 : i64, tpu.core_type = #tpu.core_type<tc>, window_params = [{transform_indices = @transform_0, window_bounds = array<i64: 32, 32>}, {pipeline_mode = #tpu.pipeline_mode<synchronous>, transform_indices = @transform_1, window_bounds = array<i64: 32, 32>}, {pipeline_mode = #tpu.pipeline_mode<synchronous>, transform_indices = @transform_2, window_bounds = array<i64: 1, 32>}, {pipeline_mode = #tpu.pipeline_mode<synchronous>, transform_indices = @transform_3, window_bounds = array<i64: 32, 32>}, {pipeline_mode = #tpu.pipeline_mode<synchronous>, transform_indices = @transform_4, window_bounds = array<i64: 1, 32>}, {pipeline_mode = #tpu.pipeline_mode<synchronous>, transform_indices = @transform_5, window_bounds = array<i64: 32, 8>}, {pipeline_mode = #tpu.pipeline_mode<synchronous>, transform_indices = @transform_6, window_bounds = array<i64: 1, 8>}, {transform_indices = @transform_7, window_bounds = array<i64: 32, 128>}, {pipeline_mode = #tpu.pipeline_mode<synchronous>, transform_indices = @transform_8, window_bounds = array<i64: 128, 16>}, {transform_indices = @transform_9, window_bounds = array<i64: 32, 16>}]} {
    %c0 = arith.constant 0 : index
    %c0_0 = arith.constant 0 : index
    %0 = vector.load %arg1[%c0, %c0_0] : memref<32x32xbf16, #tpu.memory_space<vmem>>, vector<32x32xbf16>
    %c0_1 = arith.constant 0 : index
    %c0_2 = arith.constant 0 : index
    %1 = vector.load %arg2[%c0_1, %c0_2] : memref<32x32xbf16, #tpu.memory_space<vmem>>, vector<32x32xbf16>
    %cst = arith.constant dense<0.000000e+00> : vector<32x32xf32>
    %2 = tpu.matmul %0, %1, %cst {dimension_numbers = #tpu.dot_dimension_numbers<[1], [0], [0], [1], [0, 0, 1, 1], [], []>} : vector<32x32xbf16>, vector<32x32xbf16>, vector<32x32xf32> -> vector<32x32xf32>
    %c0_3 = arith.constant 0 : index
    %c0_4 = arith.constant 0 : index
    %3 = vector.load %arg3[%c0_3, %c0_4] : memref<1x32xf32, #tpu.memory_space<vmem>>, vector<1x32xf32>
    %4 = vector.broadcast %3 : vector<1x32xf32> to vector<32x32xf32>
    %5 = arith.addf %2, %4 : vector<32x32xf32>
    %cst_5 = arith.constant 0.000000e+00 : f32
    %6 = vector.broadcast %cst_5 : f32 to vector<32x32xf32>
    %7 = arith.maximumf %5, %6 : vector<32x32xf32>
    %8 = arith.truncf %7 : vector<32x32xf32> to vector<32x32xbf16>
    %c0_6 = arith.constant 0 : index
    %c0_7 = arith.constant 0 : index
    %9 = vector.load %arg4[%c0_6, %c0_7] : memref<32x32xbf16, #tpu.memory_space<vmem>>, vector<32x32xbf16>
    %cst_8 = arith.constant dense<0.000000e+00> : vector<32x32xf32>
    %10 = tpu.matmul %8, %9, %cst_8 {dimension_numbers = #tpu.dot_dimension_numbers<[1], [0], [0], [1], [0, 0, 1, 1], [], []>} : vector<32x32xbf16>, vector<32x32xbf16>, vector<32x32xf32> -> vector<32x32xf32>
    %c0_9 = arith.constant 0 : index
    %c0_10 = arith.constant 0 : index
    %11 = vector.load %arg5[%c0_9, %c0_10] : memref<1x32xf32, #tpu.memory_space<vmem>>, vector<1x32xf32>
    %12 = vector.broadcast %11 : vector<1x32xf32> to vector<32x32xf32>
    %13 = arith.addf %10, %12 : vector<32x32xf32>
    %cst_11 = arith.constant 0.000000e+00 : f32
    %14 = vector.broadcast %cst_11 : f32 to vector<32x32xf32>
    %15 = arith.maximumf %13, %14 : vector<32x32xf32>
    %16 = arith.truncf %15 : vector<32x32xf32> to vector<32x32xbf16>
    %c0_12 = arith.constant 0 : index
    %c0_13 = arith.constant 0 : index
    %17 = vector.load %arg6[%c0_12, %c0_13] : memref<32x8xbf16, #tpu.memory_space<vmem>>, vector<32x8xbf16>
    %cst_14 = arith.constant dense<0.000000e+00> : vector<32x8xf32>
    %18 = tpu.matmul %16, %17, %cst_14 {dimension_numbers = #tpu.dot_dimension_numbers<[1], [0], [0], [1], [0, 0, 1, 1], [], []>} : vector<32x32xbf16>, vector<32x8xbf16>, vector<32x8xf32> -> vector<32x8xf32>
    %c0_15 = arith.constant 0 : index
    %c0_16 = arith.constant 0 : index
    %19 = vector.load %arg7[%c0_15, %c0_16] : memref<1x8xf32, #tpu.memory_space<vmem>>, vector<1x8xf32>
    %20 = vector.broadcast %19 : vector<1x8xf32> to vector<32x8xf32>
    %21 = arith.addf %18, %20 : vector<32x8xf32>
    %22 = tpu.concatenate %21, %21, %21, %21, %21, %21, %21, %21, %21, %21, %21, %21, %21, %21, %21, %21 in 1 : vector<32x8xf32>, vector<32x8xf32>, vector<32x8xf32>, vector<32x8xf32>, vector<32x8xf32>, vector<32x8xf32>, vector<32x8xf32>, vector<32x8xf32>, vector<32x8xf32>, vector<32x8xf32>, vector<32x8xf32>, vector<32x8xf32>, vector<32x8xf32>, vector<32x8xf32>, vector<32x8xf32>, vector<32x8xf32> -> vector<32x128xf32>
    %c0_17 = arith.constant 0 : index
    %c0_18 = arith.constant 0 : index
    %23 = vector.load %arg8[%c0_17, %c0_18] : memref<32x128xbf16, #tpu.memory_space<vmem>>, vector<32x128xbf16>
    %24 = arith.extf %23 : vector<32x128xbf16> to vector<32x128xf32>
    %25 = arith.mulf %22, %24 : vector<32x128xf32>
    %26 = arith.truncf %25 : vector<32x128xf32> to vector<32x128xbf16>
    %c0_19 = arith.constant 0 : index
    %c0_20 = arith.constant 0 : index
    %27 = vector.load %arg9[%c0_19, %c0_20] : memref<128x16xbf16, #tpu.memory_space<vmem>>, vector<128x16xbf16>
    %cst_21 = arith.constant dense<0.000000e+00> : vector<32x16xf32>
    %28 = tpu.matmul %26, %27, %cst_21 {dimension_numbers = #tpu.dot_dimension_numbers<[1], [0], [0], [1], [0, 0, 1, 1], [], []>} : vector<32x128xbf16>, vector<128x16xbf16>, vector<32x16xf32> -> vector<32x16xf32>
    %c0_22 = arith.constant 0 : index
    %c0_23 = arith.constant 0 : index
    %29 = vector.load %arg10[%c0_22, %c0_23] : memref<32x16xf32, #tpu.memory_space<vmem>>, vector<32x16xf32>
    tpu.vector_store %arg10[%c0_22, %c0_23], %28 {strides = array<i32>} : memref<32x16xf32, #tpu.memory_space<vmem>>, vector<32x16xf32>,
    return
  }
  func.func @transform_0(%arg0: i32) -> (i32, i32) {
    %c0_i32 = arith.constant 0 : i32
    %c0_i32_0 = arith.constant 0 : i32
    return %arg0, %c0_i32 : i32, i32
  }
  func.func @transform_1(%arg0: i32) -> (i32, i32) {
    %c0_i32 = arith.constant 0 : i32
    %c0_i32_0 = arith.constant 0 : i32
    %c0_i32_1 = arith.constant 0 : i32
    return %c0_i32, %c0_i32_0 : i32, i32
  }
  func.func @transform_2(%arg0: i32) -> (i32, i32) {
    %c0_i32 = arith.constant 0 : i32
    %c0_i32_0 = arith.constant 0 : i32
    %c0_i32_1 = arith.constant 0 : i32
    return %c0_i32, %c0_i32_0 : i32, i32
  }
  func.func @transform_3(%arg0: i32) -> (i32, i32) {
    %c0_i32 = arith.constant 0 : i32
    %c0_i32_0 = arith.constant 0 : i32
    %c0_i32_1 = arith.constant 0 : i32
    return %c0_i32, %c0_i32_0 : i32, i32
  }
  func.func @transform_4(%arg0: i32) -> (i32, i32) {
    %c0_i32 = arith.constant 0 : i32
    %c0_i32_0 = arith.constant 0 : i32
    %c0_i32_1 = arith.constant 0 : i32
    return %c0_i32, %c0_i32_0 : i32, i32
  }
  func.func @transform_5(%arg0: i32) -> (i32, i32) {
    %c0_i32 = arith.constant 0 : i32
    %c0_i32_0 = arith.constant 0 : i32
    %c0_i32_1 = arith.constant 0 : i32
    return %c0_i32, %c0_i32_0 : i32, i32
  }
  func.func @transform_6(%arg0: i32) -> (i32, i32) {
    %c0_i32 = arith.constant 0 : i32
    %c0_i32_0 = arith.constant 0 : i32
    %c0_i32_1 = arith.constant 0 : i32
    return %c0_i32, %c0_i32_0 : i32, i32
  }
  func.func @transform_7(%arg0: i32) -> (i32, i32) {
    %c0_i32 = arith.constant 0 : i32
    %c0_i32_0 = arith.constant 0 : i32
    return %arg0, %c0_i32 : i32, i32
  }
  func.func @transform_8(%arg0: i32) -> (i32, i32) {
    %c0_i32 = arith.constant 0 : i32
    %c0_i32_0 = arith.constant 0 : i32
    %c0_i32_1 = arith.constant 0 : i32
    return %c0_i32, %c0_i32_0 : i32, i32
  }
  func.func @transform_9(%arg0: i32) -> (i32, i32) {
    %c0_i32 = arith.constant 0 : i32
    %c0_i32_0 = arith.constant 0 : i32
    return %arg0, %c0_i32 : i32, i32
  }
}

</mosaic_0001>

<bundles_post_ra>
// kernel: tpu_custom_call.1
= control target key start
LH: loop header
LB: loop body
LE: loop exit
PB: predicated region body
PF: predicated region fallthrough
CT: control target
= control target key end

     0   :  { %s1302_s30 = smov 0   ;;  %s1591_s0 = inlined_call_operand.vmem [shape: bf16[64,32], index: 0, kind: input, shape index: {}]   ;;  %s1592_s1 = inlined_call_operand.vmem [shape: bf16[32,32], index: 1, kind: input, shape index: {}]   ;;  %s1593_s2 = inlined_call_operand.vmem [shape: f32[1,32], index: 2, kind: input, shape index: {}]   ;;  %s1594_s3 = inlined_call_operand.vmem [shape: bf16[32,32], index: 3, kind: input, shape index: {}]   ;;  %s1595_s4 = inlined_call_operand.vmem [shape: f32[1,32], index: 4, kind: input, shape index: {}]   ;;  %s1596_s5 = inlined_call_operand.vmem [shape: bf16[32,8], index: 5, kind: input, shape index: {}]   ;;  %s1597_s6 = inlined_call_operand.vmem [shape: f32[1,8], index: 6, kind: input, shape index: {}]   ;;  %s1598_s7 = inlined_call_operand.vmem [shape: bf16[64,128], index: 7, kind: input, shape index: {}]   ;;  %s1599_s8 = inlined_call_operand.vmem [shape: bf16[128,16], index: 8, kind: input, shape index: {}]   ;;  %s1600_s9 = inlined_call_operand.vmem [shape: f32[64,16], index: 9, kind: output, shape index: {}]  }
   0x1 LB: > { %s1077_s10 = sadd.s32 4294967295, %s1235_s30   ;;  %p1081_p0 = scmp.ge.s32.totalorder %s1235_s30, 1  ;;  %s1235_s30 = sphi %s1302_s30, %s19_s30  }
   0x2   : > { %p299_p1 = scmp.lt.s32.totalorder %s1235_s30, 3 }
   0x4   : > { %p300_p2 = pnand %p1081_p0, %p299_p1 }
   0x5   : > { %s1082_s13 = sshll.u32 (!%p300_p2), %s1077_s10, 2  ;;  %s1237_s15 = smov (!%p300_p2), 16  }
   0x6   : > { %303 = sbr.rel (%p300_p2) target bundleno = 1063 (0x427), region = 56  ;;  %p341_p3 = scmp.lt.s32.totalorder (!%p300_p2), %s1082_s13, 7 }
   0x7   : > { %s1238_s17 = smov (!%p300_p2), 8   ;;  %s1239_s18 = smov (!%p300_p2), 24  }
   0x8   : > { %s1241_s20 = smov (!%p300_p2), 40   ;;  %s1242_s21 = smov (!%p300_p2), 48  }
   0x9   : > { %s1243_s22 = smov (!%p300_p2), 56   ;;  %s1244_s23 = smov (!%p300_p2), 64  }
   0xa   : > { %s1245_s24 = smov (!%p300_p2), 72   ;;  %s1246_s25 = smov (!%p300_p2), 80  }
   0xb   : > { %v1213_v0 = vld [vmem:[%s1592_s1 + $0x8] sm:$0xff]   ;;  %v1214_v1 = vld [vmem:[%s1592_s1] sm:$0xff]   ;;  %s1602_s13 = smov (!%p341_p3, %s1082_s13), 7  ;;  %vm396_vm0 = vcmask 261120   ;;  %s1247_s26 = smov 88   ;;  %v1221_v47 = vld [vmem:[%s1599_s8 + $0x38] sm:$0xff]  }
   0xc   : > { %1146 = vmatprep.subr.bf16.mxu0 %v1213_v0  ;;  %s1083_s16 = sshll.u32 %s1602_s13, 2  ;;  %v1217_v4 = vld [vmem:[%s1594_s3 + $0x8] sm:$0xff]   ;;  %v1218_v5 = vld [vmem:[%s1594_s3] sm:$0xff]   ;;  %s1248_s27 = smov 96   ;;  %1170 = vmatprep.subr.bf16.mxu1 %v1221_v47  ;;  %v1222_v48 = vld [vmem:[%s1599_s8 + $0x30] sm:$0xff]   ;;  %vm804_vm1 = vcmask 64512  }
   0xd   : > { %1147 = vmatpush3.bf16.msra.mxu0 %v1213_v0  ;;  %s344_s19 = scalar_lea.vmem %s1591_s0, %s1083_s16  ;;  %v1088_v8 = vld [vmem:[%s1593_s2] ss:$0 sm:$0xff]  ;;  %v1219_v21 = vld [vmem:[%s1596_s5 + $0x8] sm:$0xff]   ;;  %s1249_s28 = smov 104   ;;  %1171 = vmatpush3.bf16.msra.mxu1 %v1221_v47  ;;  %v1225_v51 = vld [vmem:[%s1599_s8 + $0x18] sm:$0xff]   ;;  %vm809_vm2 = vcmask 130048  }
   0xe   : > { %1148 = vmatprep.subr.bf16.mxu0 %v1214_v1  ;;  %v1215_v2 = vld [vmem:[%s344_s19] sm:$0xff]   ;;  %v1216_v3 = vld [vmem:[%s344_s19 + $0x8] sm:$0xff]   ;;  %s1240_s19 = smov 32   ;;  %s1250_s29 = smov 112   ;;  %1172 = vmatprep.subr.bf16.mxu1 %v1222_v48  ;;  %v1226_v52 = vld [vmem:[%s1599_s8 + $0x10] sm:$0xff]   ;;  %vm814_vm3 = vcmask 195584  }
   0xf   : > { %1150 = vmatprep.mubr.msk.bf16.mxu0 %vm396_vm0, %v1215_v2  ;;  %v1220_v22 = vld [vmem:[%s1596_s5] sm:$0xff]   ;;  %v1223_v49 = vld [vmem:[%s1599_s8 + $0x28] sm:$0xff]   ;;  %vm823_vm4 = vcmask 326656   ;;  %vm828_vm5 = vcmask 392192   ;;  %vm833_vm6 = vcmask 457728   ;;  %vm838_vm7 = vcmask 523264  }
  0x10   : > { %v1095_v25 = vld [vmem:[%s1595_s4] ss:$0 sm:$0xff]  ;;  %v1227_v53 = vld [vmem:[%s1599_s8 + $0x8] sm:$0xff]   ;;  %vm843_vm8 = vcmask 588800   ;;  %vm848_vm9 = vcmask 654336   ;;  %vm853_vm10 = vcmask 719872  }
  0x11   : > { %1149 = vmatpush3.bf16.msra.mxu0 %v1214_v1  ;;  %v1100_v38 = vld [vmem:[%s1597_s6] ss:$0 sm:$0xff]  ;;  %1173 = vmatpush3.bf16.msra.mxu1 %v1222_v48  ;;  %vm858_vm11 = vcmask 785408   ;;  %vm863_vm12 = vcmask 850944   ;;  %vm873_vm13 = vcmask 982016   ;;  %vm868_vm14 = vcmask 916480  }
  0x12   : > { %1154 = vmatprep.subr.bf16.mxu0 %v1217_v4  ;;  %1174 = vmatprep.subr.bf16.mxu1 %v1223_v49  ;;  %v1224_v50 = vld [vmem:[%s1599_s8 + $0x20] sm:$0xff]  }
  0x13   : > { %v1228_v54 = vld [vmem:[%s1599_s8] sm:$0xff]  }
  0x14   : > { %1151 = vmatmul.mubr.msk.bf16.vlgmr.msra.gmra.mxu0 %vm396_vm0, %v1216_v3 }
  0x15   : > { %1155 = vmatpush3.bf16.msra.mxu0 %v1217_v4  ;;  %1175 = vmatpush3.bf16.msra.mxu1 %v1223_v49 }
  0x16   : > { %1156 = vmatprep.subr.bf16.mxu0 %v1218_v5  ;;  %1176 = vmatprep.subr.bf16.mxu1 %v1224_v50 }
  0x19   : > { %1157 = vmatpush3.bf16.msra.mxu0 %v1218_v5  ;;  %1177 = vmatpush3.bf16.msra.mxu1 %v1224_v50 }
  0x1a   : > { %1162 = vmatprep.subr.bf16.mxu0 %v1219_v21  ;;  %1178 = vmatprep.subr.bf16.mxu1 %v1225_v51 }
  0x1d   : > { %1179 = vmatpush3.bf16.msra.mxu1 %v1225_v51 }
  0x1e   : > { %1180 = vmatprep.subr.bf16.mxu1 %v1226_v52 }
  0x21   : > { %1181 = vmatpush3.bf16.msra.mxu1 %v1226_v52 }
  0x22   : > { %1182 = vmatprep.subr.bf16.mxu1 %v1227_v53 }
  0x25   : > { %1183 = vmatpush3.bf16.msra.mxu1 %v1227_v53 }
  0x26   : > { %1184 = vmatprep.subr.bf16.mxu1 %v1228_v54 }
  0x29   : > { %1185 = vmatpush3.bf16.msra.mxu1 %v1228_v54 }
  0xd4   : > { %v1152_v6 = vpop.f32.mrf.mxu0 }
  0xd5   : > { %v446_v12 = vadd.f32 %v1152_v6, %v1088_v8 }
  0xd6   : > { %v437_v7 = vpop.f32.mrf.mxu0 }
  0xd7   : > { %v438_v10 = vadd.f32 %v1088_v8, %v437_v7  ;;  %v454_v18 = vmax.f32 %v446_v12, 0.0 }
  0xd8   : > { %v1153_v9 = vpop.f32.mrf.mxu0 }
  0xd9   : > { %v449_v11 = vadd.f32 %v1153_v9, %v1088_v8  ;;  %v452_v16 = vmax.f32 %v438_v10, 0.0 }
  0xda   : > { %v440_v13 = vpop.f32.mrf.mxu0 }
  0xdb   : > { %v441_v14 = vadd.f32 %v1088_v8, %v440_v13  ;;  %v455_v15 = vmax.f32 %v449_v11, 0.0 }
  0xdd   : > { %v453_v17 = vmax.f32 %v441_v14, 0.0  ;;  %v457_v20 = vpack.c.bf16 %v455_v15, %v454_v18 }
  0xdf   : > { %v456_v19 = vpack.c.bf16 %v453_v17, %v452_v16 }
  0xe1   : > { %1158 = vmatprep.mubr.msk.bf16.mxu0 %vm396_vm0, %v456_v19 }
  0xe2   : > { %1159 = vmatmul.mubr.msk.bf16.vlgmr.msra.gmra.mxu0 %vm396_vm0, %v457_v20 }
  0xe3   : > { %1163 = vmatpush3.bf16.msra.mxu0 %v1219_v21 }
  0xe4   : > { %1164 = vmatprep.subr.bf16.mxu0 %v1220_v22 }
  0xe7   : > { %1165 = vmatpush3.bf16.msra.mxu0 %v1220_v22 }
 0x1a2   : > { %v1160_v23 = vpop.f32.mrf.mxu0 }
 0x1a3   : > { %v530_v29 = vadd.f32 %v1160_v23, %v1095_v25 }
 0x1a4   : > { %v521_v24 = vpop.f32.mrf.mxu0 }
 0x1a5   : > { %v522_v27 = vadd.f32 %v1095_v25, %v521_v24  ;;  %v538_v35 = vmax.f32 %v530_v29, 0.0 }
 0x1a6   : > { %v1161_v26 = vpop.f32.mrf.mxu0 }
 0x1a7   : > { %v533_v28 = vadd.f32 %v1161_v26, %v1095_v25  ;;  %v536_v33 = vmax.f32 %v522_v27, 0.0 }
 0x1a8   : > { %v524_v30 = vpop.f32.mrf.mxu0 }
 0x1a9   : > { %v525_v31 = vadd.f32 %v1095_v25, %v524_v30  ;;  %v539_v32 = vmax.f32 %v533_v28, 0.0 }
 0x1ab   : > { %v537_v34 = vmax.f32 %v525_v31, 0.0  ;;  %v541_v37 = vpack.c.bf16 %v539_v32, %v538_v35 }
 0x1ad   : > { %v540_v36 = vpack.c.bf16 %v537_v34, %v536_v33 }
 0x1af   : > { %1166 = vmatprep.mubr.msk.bf16.mxu0 %vm396_vm0, %v540_v36 }
 0x1b0   : > { %1167 = vmatmul.mubr.msk.bf16.vlgmr.msra.gmra.mxu0 %vm396_vm0, %v541_v37 }
 0x270   : > { %v1168_v39 = vpop.f32.mrf.mxu0 }
 0x271   : > { %v1351_v40 = vadd.f32 %v1168_v39, %v1100_v38 }
 0x272   : > { %v605_v41 = vpop.f32.mrf.mxu0 }
 0x273   : > { %640 = vrot.lane.b32.xlu0 %v1351_v40, %s1237_s15  ;;  %628 = vrot.lane.b32.xlu1 %v1351_v40, %s1238_s17  ;;  %v1403_v44 = vadd.f32 %v1100_v38, %v605_v41 }
 0x274   : > { %v1169_v42 = vpop.f32.mrf.mxu0 }
 0x275   : > { %v1357_v43 = vadd.f32 %v1169_v42, %v1100_v38 }
 0x276   : > { %v608_v45 = vpop.f32.mrf.mxu0 }
 0x277   : > { %652 = vrot.lane.b32.xlu0 %v1351_v40, %s1239_s18  ;;  %630 = vrot.lane.b32.xlu1 %v1357_v43, %s1238_s17  ;;  %v1417_v46 = vadd.f32 %v1100_v38, %v608_v45 }
 0x27b   : > { %664 = vrot.lane.b32.xlu0 %v1351_v40, %s1240_s19  ;;  %642 = vrot.lane.b32.xlu1 %v1357_v43, %s1237_s15 }
 0x27f   : > { %676 = vrot.lane.b32.xlu0 %v1351_v40, %s1241_s20  ;;  %654 = vrot.lane.b32.xlu1 %v1357_v43, %s1239_s18 }
 0x283   : > { %688 = vrot.lane.b32.xlu0 %v1351_v40, %s1242_s21  ;;  %666 = vrot.lane.b32.xlu1 %v1357_v43, %s1240_s19 }
 0x287   : > { %700 = vrot.lane.b32.xlu0 %v1351_v40, %s1243_s22  ;;  %678 = vrot.lane.b32.xlu1 %v1357_v43, %s1241_s20 }
 0x28b   : > { %712 = vrot.lane.b32.xlu0 %v1351_v40, %s1244_s23  ;;  %690 = vrot.lane.b32.xlu1 %v1357_v43, %s1242_s21 }
 0x28f   : > { %724 = vrot.lane.b32.xlu0 %v1351_v40, %s1245_s24  ;;  %702 = vrot.lane.b32.xlu1 %v1357_v43, %s1243_s22 }
 0x293   : > { %736 = vrot.lane.b32.xlu0 %v1351_v40, %s1246_s25  ;;  %714 = vrot.lane.b32.xlu1 %v1357_v43, %s1244_s23 }
 0x297   : > { %748 = vrot.lane.b32.xlu0 %v1351_v40, %s1247_s26  ;;  %726 = vrot.lane.b32.xlu1 %v1357_v43, %s1245_s24 }
 0x29b   : > { %760 = vrot.lane.b32.xlu0 %v1351_v40, %s1248_s27  ;;  %738 = vrot.lane.b32.xlu1 %v1357_v43, %s1246_s25 }
 0x29f   : > { %772 = vrot.lane.b32.xlu0 %v1351_v40, %s1249_s28  ;;  %750 = vrot.lane.b32.xlu1 %v1357_v43, %s1247_s26 }
 0x2a3   : > { %762 = vrot.lane.b32.xlu1 %v1357_v43, %s1248_s27  ;;  %624 = vrot.lane.b32.xlu0 %v1403_v44, %s1238_s17 }
 0x2a7   : > { %774 = vrot.lane.b32.xlu1 %v1357_v43, %s1249_s28  ;;  %636 = vrot.lane.b32.xlu0 %v1403_v44, %s1237_s15 }
 0x2ab   : > { %786 = vrot.lane.b32.xlu1 %v1357_v43, %s1250_s29  ;;  %648 = vrot.lane.b32.xlu0 %v1403_v44, %s1239_s18 }
 0x2af   : > { %638 = vrot.lane.b32.xlu1 %v1417_v46, %s1237_s15  ;;  %660 = vrot.lane.b32.xlu0 %v1403_v44, %s1240_s19 }
 0x2b3   : > { %650 = vrot.lane.b32.xlu1 %v1417_v46, %s1239_s18  ;;  %672 = vrot.lane.b32.xlu0 %v1403_v44, %s1241_s20 }
 0x2b7   : > { %662 = vrot.lane.b32.xlu1 %v1417_v46, %s1240_s19  ;;  %684 = vrot.lane.b32.xlu0 %v1403_v44, %s1242_s21 }
 0x2bb   : > { %674 = vrot.lane.b32.xlu1 %v1417_v46, %s1241_s20  ;;  %696 = vrot.lane.b32.xlu0 %v1403_v44, %s1243_s22 }
 0x2bf   : > { %686 = vrot.lane.b32.xlu1 %v1417_v46, %s1242_s21  ;;  %708 = vrot.lane.b32.xlu0 %v1403_v44, %s1244_s23 }
 0x2c3   : > { %698 = vrot.lane.b32.xlu1 %v1417_v46, %s1243_s22  ;;  %720 = vrot.lane.b32.xlu0 %v1403_v44, %s1245_s24 }
 0x2c7   : > { %710 = vrot.lane.b32.xlu1 %v1417_v46, %s1244_s23  ;;  %732 = vrot.lane.b32.xlu0 %v1403_v44, %s1246_s25 }
 0x2cb   : > { %722 = vrot.lane.b32.xlu1 %v1417_v46, %s1245_s24  ;;  %744 = vrot.lane.b32.xlu0 %v1403_v44, %s1247_s26 }
 0x2cf   : > { %734 = vrot.lane.b32.xlu1 %v1417_v46, %s1246_s25  ;;  %756 = vrot.lane.b32.xlu0 %v1403_v44, %s1248_s27 }
 0x2d3   : > { %746 = vrot.lane.b32.xlu1 %v1417_v46, %s1247_s26  ;;  %768 = vrot.lane.b32.xlu0 %v1403_v44, %s1249_s28 }
 0x2d7   : > { %758 = vrot.lane.b32.xlu1 %v1417_v46, %s1248_s27  ;;  %626 = vrot.lane.b32.xlu0 %v1417_v46, %s1238_s17  ;;  %s1251_s17 = smov 120  }
 0x2db   : > { %770 = vrot.lane.b32.xlu1 %v1417_v46, %s1249_s28  ;;  %780 = vrot.lane.b32.xlu0 %v1403_v44, %s1250_s29  ;;  %s350_s28 = scalar_lea.vmem %s1598_s7, %s1083_s16  ;;  %s1087_s16 = sshll.u32 %s1602_s13, 3 }
 0x2dc   : > { %s356_s15 = scalar_lea.vmem %s1600_s9, %s1087_s16 }
 0x2df   : > { %782 = vrot.lane.b32.xlu1 %v1417_v46, %s1250_s29  ;;  %784 = vrot.lane.b32.xlu0 %v1351_v40, %s1250_s29 }
 0x2e3   : > { %794 = vrot.lane.b32.xlu1 %v1417_v46, %s1251_s17  ;;  %792 = vrot.lane.b32.xlu0 %v1403_v44, %s1251_s17 }
 0x2e5   : > { %v641_v55 = vpop.permute.xlu0 %640  ;;  %v629_v56 = vpop.permute.xlu1 %628 }
 0x2e6   : > { %v807_v57 = vsel %vm804_vm1, %v1351_v40, %v629_v56 }
 0x2e7   : > { %798 = vrot.lane.b32.xlu1 %v1357_v43, %s1251_s17  ;;  %796 = vrot.lane.b32.xlu0 %v1351_v40, %s1251_s17  ;;  %v812_v58 = vsel %vm809_vm2, %v807_v57, %v641_v55 }
 0x2e9   : > { %v653_v59 = vpop.permute.xlu0 %652  ;;  %v631_v60 = vpop.permute.xlu1 %630 }
 0x2ea   : > { %v817_v61 = vsel %vm814_vm3, %v812_v58, %v653_v59  ;;  %v808_v62 = vsel %vm804_vm1, %v1357_v43, %v631_v60 }
 0x2ed   : > { %v665_v63 = vpop.permute.xlu0 %664  ;;  %v643_v0 = vpop.permute.xlu1 %642 }
 0x2ee   : > { %v821_v1 = vsel %vm396_vm0, %v817_v61, %v665_v63  ;;  %v813_v2 = vsel %vm809_vm2, %v808_v62, %v643_v0 }
 0x2f1   : > { %v677_v3 = vpop.permute.xlu0 %676  ;;  %v655_v4 = vpop.permute.xlu1 %654 }
 0x2f2   : > { %v826_v5 = vsel %vm823_vm4, %v821_v1, %v677_v3  ;;  %v818_v6 = vsel %vm814_vm3, %v813_v2, %v655_v4 }
 0x2f5   : > { %v689_v7 = vpop.permute.xlu0 %688  ;;  %v667_v8 = vpop.permute.xlu1 %666 }
 0x2f6   : > { %v831_v9 = vsel %vm828_vm5, %v826_v5, %v689_v7  ;;  %v822_v10 = vsel %vm396_vm0, %v818_v6, %v667_v8 }
 0x2f9   : > { %v701_v11 = vpop.permute.xlu0 %700  ;;  %v679_v12 = vpop.permute.xlu1 %678 }
 0x2fa   : > { %v836_v13 = vsel %vm833_vm6, %v831_v9, %v701_v11  ;;  %v827_v14 = vsel %vm823_vm4, %v822_v10, %v679_v12 }
 0x2fd   : > { %v713_v15 = vpop.permute.xlu0 %712  ;;  %v691_v16 = vpop.permute.xlu1 %690 }
 0x2fe   : > { %v841_v17 = vsel %vm838_vm7, %v836_v13, %v713_v15  ;;  %v832_v18 = vsel %vm828_vm5, %v827_v14, %v691_v16 }
 0x301   : > { %v725_v19 = vpop.permute.xlu0 %724  ;;  %v703_v20 = vpop.permute.xlu1 %702 }
 0x302   : > { %v846_v21 = vsel %vm843_vm8, %v841_v17, %v725_v19  ;;  %v837_v22 = vsel %vm833_vm6, %v832_v18, %v703_v20 }
 0x305   : > { %v737_v23 = vpop.permute.xlu0 %736  ;;  %v715_v24 = vpop.permute.xlu1 %714 }
 0x306   : > { %v851_v25 = vsel %vm848_vm9, %v846_v21, %v737_v23  ;;  %v842_v26 = vsel %vm838_vm7, %v837_v22, %v715_v24 }
 0x309   : > { %v749_v27 = vpop.permute.xlu0 %748  ;;  %v727_v28 = vpop.permute.xlu1 %726 }
 0x30a   : > { %v856_v29 = vsel %vm853_vm10, %v851_v25, %v749_v27  ;;  %v847_v30 = vsel %vm843_vm8, %v842_v26, %v727_v28  ;;  %v1116_v28 = vld [vmem:[%s350_s28] sm:$0xff]  }
 0x30d   : > { %v761_v31 = vpop.permute.xlu0 %760  ;;  %v739_v32 = vpop.permute.xlu1 %738 }
 0x30e   : > { %v861_v33 = vsel %vm858_vm11, %v856_v29, %v761_v31  ;;  %v852_v34 = vsel %vm848_vm9, %v847_v30, %v739_v32 }
 0x311   : > { %v773_v35 = vpop.permute.xlu0 %772  ;;  %v751_v36 = vpop.permute.xlu1 %750 }
 0x312   : > { %v1524_v37 = vsel %vm863_vm12, %v861_v33, %v773_v35  ;;  %v857_v38 = vsel %vm853_vm10, %v852_v34, %v751_v36  ;;  %v1123_v33 = vld [vmem:[%s350_s28 + $0x8] sm:$0xff]  }
 0x315   : > { %v763_v39 = vpop.permute.xlu1 %762  ;;  %v625_v40 = vpop.permute.xlu0 %624 }
 0x316   : > { %v1528_v41 = vsel %vm858_vm11, %v857_v38, %v763_v39  ;;  %v805_v4 = vsel %vm804_vm1, %v1403_v44, %v625_v40  ;;  %v1117_v39 = vunpack.c.l.bf16 %v1116_v28  ;;  %v1118_v40 = vunpack.c.h.bf16 %v1116_v28 }
 0x319   : > { %v1530_v42 = vpop.permute.xlu1 %774  ;;  %v637_v43 = vpop.permute.xlu0 %636 }
 0x31a   : > { %v810_v5 = vsel %vm809_vm2, %v805_v4, %v637_v43 }
 0x31d   : > { %v1532_v45 = vpop.permute.xlu1 %786  ;;  %v649_v47 = vpop.permute.xlu0 %648 }
 0x31e   : > { %v815_v8 = vsel %vm814_vm3, %v810_v5, %v649_v47 }
 0x321   : > { %v639_v48 = vpop.permute.xlu1 %638  ;;  %v661_v49 = vpop.permute.xlu0 %660 }
 0x322   : > { %v819_v10 = vsel %vm396_vm0, %v815_v8, %v661_v49  ;;  %v1122_v49 = vunpack.c.h.bf16 %v1123_v33 }
 0x325   : > { %v651_v50 = vpop.permute.xlu1 %650  ;;  %v673_v51 = vpop.permute.xlu0 %672 }
 0x326   : > { %v824_v12 = vsel %vm823_vm4, %v819_v10, %v673_v51  ;;  %v867_v51 = vsel %vm863_vm12, %v1528_v41, %v1530_v42 }
 0x329   : > { %v663_v52 = vpop.permute.xlu1 %662  ;;  %v685_v53 = vpop.permute.xlu0 %684 }
 0x32a   : > { %v829_v44 = vsel %vm828_vm5, %v824_v12, %v685_v53  ;;  %v872_v53 = vsel %vm868_vm14, %v867_v51, %v1532_v45 }
 0x32d   : > { %v675_v54 = vpop.permute.xlu1 %674  ;;  %v697_v55 = vpop.permute.xlu0 %696 }
 0x32e   : > { %v834_v17 = vsel %vm833_vm6, %v829_v44, %v697_v55 }
 0x331   : > { %v687_v56 = vpop.permute.xlu1 %686  ;;  %v709_v57 = vpop.permute.xlu0 %708 }
 0x335   : > { %v699_v58 = vpop.permute.xlu1 %698  ;;  %v721_v59 = vpop.permute.xlu0 %720 }
 0x339   : > { %v711_v60 = vpop.permute.xlu1 %710  ;;  %v733_v61 = vpop.permute.xlu0 %732 }
 0x33d   : > { %v723_v62 = vpop.permute.xlu1 %722  ;;  %v745_v63 = vpop.permute.xlu0 %744 }
 0x341   : > { %v735_v0 = vpop.permute.xlu1 %734  ;;  %v757_v1 = vpop.permute.xlu0 %756 }
 0x345   : > { %v747_v2 = vpop.permute.xlu1 %746  ;;  %v769_v3 = vpop.permute.xlu0 %768 }
 0x349   : > { %v759_v6 = vpop.permute.xlu1 %758  ;;  %v627_v7 = vpop.permute.xlu0 %626 }
 0x34a   : > { %v806_v9 = vsel %vm804_vm1, %v1417_v46, %v627_v7  ;;  %v839_v46 = vsel %vm838_vm7, %v834_v17, %v709_v57 }
 0x34b   : > { %v811_v11 = vsel %vm809_vm2, %v806_v9, %v639_v48  ;;  %v844_v20 = vsel %vm843_vm8, %v839_v46, %v721_v59 }
 0x34c   : > { %v816_v13 = vsel %vm814_vm3, %v811_v11, %v651_v50  ;;  %v849_v22 = vsel %vm848_vm9, %v844_v20, %v733_v61  ;;  %v1121_v50 = vunpack.c.l.bf16 %v1123_v33 }
 0x34d   : > { %v820_v14 = vsel %vm396_vm0, %v816_v13, %v663_v52  ;;  %v771_v15 = vpop.permute.xlu1 %770  ;;  %v781_v16 = vpop.permute.xlu0 %780  ;;  %v854_v26 = vsel %vm853_vm10, %v849_v22, %v745_v63 }
 0x34e   : > { %v825_v18 = vsel %vm823_vm4, %v820_v14, %v675_v54  ;;  %v859_v29 = vsel %vm858_vm11, %v854_v26, %v757_v1 }
 0x34f   : > { %v830_v19 = vsel %vm828_vm5, %v825_v18, %v687_v56  ;;  %v864_v31 = vsel %vm863_vm12, %v859_v29, %v769_v3 }
 0x350   : > { %v835_v21 = vsel %vm833_vm6, %v830_v19, %v699_v58  ;;  %v869_v35 = vsel %vm868_vm14, %v864_v31, %v781_v16 }
 0x351   : > { %v840_v23 = vsel %vm838_vm7, %v835_v21, %v711_v60  ;;  %v783_v24 = vpop.permute.xlu1 %782  ;;  %v785_v25 = vpop.permute.xlu0 %784 }
 0x352   : > { %v845_v27 = vsel %vm843_vm8, %v840_v23, %v723_v62  ;;  %v871_v54 = vsel %vm868_vm14, %v1524_v37, %v785_v25 }
 0x353   : > { %v850_v30 = vsel %vm848_vm9, %v845_v27, %v735_v0 }
 0x354   : > { %v855_v32 = vsel %vm853_vm10, %v850_v30, %v747_v2 }
 0x355   : > { %v860_v34 = vsel %vm858_vm11, %v855_v32, %v759_v6  ;;  %v795_v36 = vpop.permute.xlu1 %794  ;;  %v793_v38 = vpop.permute.xlu0 %792 }
 0x356   : > { %v865_v43 = vsel %vm863_vm12, %v860_v34, %v771_v15  ;;  %v874_v47 = vsel %vm873_vm13, %v869_v35, %v793_v38 }
 0x357   : > { %v870_v48 = vsel %vm868_vm14, %v865_v43, %v783_v24  ;;  %v886_v57 = vmul.f32 %v1117_v39, %v874_v47 }
 0x358   : > { %v875_v52 = vsel %vm873_vm13, %v870_v48, %v795_v36 }
 0x359   : > { %v799_v55 = vpop.permute.xlu1 %798  ;;  %v797_v56 = vpop.permute.xlu0 %796  ;;  %v887_v58 = vmul.f32 %v1118_v40, %v875_v52 }
 0x35a   : > { %v877_v59 = vsel %vm873_vm13, %v872_v53, %v799_v55  ;;  %v876_v60 = vsel %vm873_vm13, %v871_v54, %v797_v56 }
 0x35b   : > { %v889_v61 = vmul.f32 %v1122_v49, %v877_v59  ;;  %v888_v62 = vmul.f32 %v1121_v50, %v876_v60  ;;  %v890_v41 = vpack.c.bf16 %v887_v58, %v886_v57 }
 0x35d   : > { %1186 = vmatprep.mubr.bf16.mxu1 %v890_v41  ;;  %v891_v42 = vpack.c.bf16 %v889_v61, %v888_v62 }
 0x35f   : > { %1187 = vmatmul.mubr.bf16.vlgmr.msra.gmra.mxu1 %v891_v42 }
 0x41f   : > { %v1188_v63 = vpop.f32.mrf.mxu1 }
 0x420   : > { %1007 = vst.msk [vmem:[%s356_s15 + $0x10] sm:$0xff] %vm809_vm2, %v1188_v63 }
 0x421   : > { %v990_v37 = vpop.f32.mrf.mxu1 }
 0x422   : > { %1005 = vst.msk [vmem:[%s356_s15] sm:$0xff] %vm809_vm2, %v990_v37 }
 0x423   : > { %v1189_v45 = vpop.f32.mrf.mxu1 }
 0x424   : > { %1008 = vst.msk [vmem:[%s356_s15 + $0x18] sm:$0xff] %vm809_vm2, %v1189_v45 }
 0x425   : > { %v993_v0 = vpop.f32.mrf.mxu1 }
 0x426   : > { %1006 = vst.msk [vmem:[%s356_s15 + $0x8] sm:$0xff] %vm809_vm2, %v993_v0 }
 0x427 PF: > { %s19_s30 = sadd.s32 1, %s1235_s30  }
 0x428   : > { %p16_p4 = scmp.ge.s32.totalorder %s19_s30, 4  }
 0x42a   :  { %18 = sbr.rel (!%p16_p4) target bundleno = 1 (0x1), region = 89 }

</bundles_post_ra>
